<compile_context>
chip_gen: v6e
topology: v6e:2x2x1
jax: 0.10.0
libtpu: 0.0.40
codegen_flags: <defaults>
</compile_context>

<pallas_src>
import functools
import math

import jax
import jax.numpy as jnp
from jax.experimental import pallas as pl
from jax.experimental.pallas import tpu as pltpu


# ----------------------------------------------------------------------------
# Static depthwise-3x3 layout / tap bookkeeping
# ----------------------------------------------------------------------------
def _round_up(x, m):
    return ((x + m - 1) // m) * m


def _dw_layout(stride, Ho, Wo):
    """Per-plane padded segment layout of the VMEM intermediate (channel-major, pixel-flat)."""
    L = Ho * Wo
    P = stride * stride
    head = _round_up(Wo, 128)                   # >= Wo zeros before the data, 128-lane aligned
    tail = Wo if stride == 1 else 0             # zeros after the data (needed only at s == 1)
    padlen = head + _round_up(L + tail, 128)    # segment length, 128-lane aligned
    return L, P, head, padlen


def _dw_groups(stride):
    """Group the 9 taps by (source plane, row offset).

    Each group needs ONE slice of the padded scratch; +-1 column taps within a group are
    XLU rolls of that slice (the wrapped lane is zeroed by the left/right border masks).
    """
    def split(d):  # spatial offset d in {-1,0,+1} -> (plane coordinate, in-plane offset)
        if stride == 1:
            return 0, d
        if d == -1:
            return stride - 1, -1
        return d, 0

    groups = {}
    for dh in range(3):
        for dw in range(3):
            ph, rh = split(dh - 1)
            pw, rw = split(dw - 1)
            plane = ph * stride + pw
            groups.setdefault((plane, rh), []).append((rw, dh * 3 + dw))
    return tuple(sorted((k, tuple(v)) for k, v in groups.items()))


def _col_masks(Wo, L):
    col = jnp.arange(L, dtype=jnp.int32) % Wo
    left = (col != 0)
    right = (col != Wo - 1)
    return jnp.stack([left, right]).astype(jnp.float32)  # (2, L)


# ----------------------------------------------------------------------------
# In-kernel depthwise 3x3 (+ folded BN bias) on a channel-major planar value
# ----------------------------------------------------------------------------
def _depthwise3x3(ypad_ref, y, wd, bd, ml, mr, *, groups, L, P, padlen, head, Wo, stride):
    C = wd.shape[0]
    zpad = jnp.zeros((C, Wo), jnp.float32)           # hoisted (no per-plane re-broadcast)
    for p in range(P):
        base = p * padlen + head
        ypad_ref[:, base - Wo:base] = zpad            # zero ONLY the pads that get read
        if stride == 1:
            ypad_ref[:, base + L:base + L + Wo] = zpad
        ypad_ref[:, base:base + L] = y[:, p * L:(p + 1) * L]   # 128-lane-aligned data store

    acc = None
    for (plane, rh), cols in groups:
        start = plane * padlen + head + rh * Wo
        s = ypad_ref[:, start:start + L]              # one slice per (plane, row-offset) group
        for rw, t in cols:
            wt = wd[:, t:t + 1]
            if rw == 0:
                contrib = wt * s
            elif rw == -1:
                contrib = (wt * pltpu.roll(s, shift=1, axis=1)) * ml       # left border masked
            else:
                contrib = (wt * pltpu.roll(s, shift=L - 1, axis=1)) * mr   # right border masked
            acc = contrib if acc is None else acc + contrib
    return acc + bd


# ----------------------------------------------------------------------------
# Kernels
# ----------------------------------------------------------------------------
def _s1_branch_kernel(x_ref, m_ref, w1_ref, b1_ref, wd_ref, bd_ref, w2_ref, b2_ref,
                      o_ref, ypad_ref, *, bf, dw_cfg):
    L = dw_cfg["L"]
    x = x_ref[...].astype(jnp.float32)                # (2*bf, L), pixels on lanes
    ml = m_ref[0:1, :]
    mr = m_ref[1:2, :]
    # branch2 on the x2 half: 1x1(+BN)+ReLU -> dw3x3(+BN) -> 1x1(+BN)+ReLU
    y = jnp.dot(w1_ref[...], x[bf:, :], preferred_element_type=jnp.float32)
    y = jnp.maximum(y + b1_ref[...], 0.0)
    z = _depthwise3x3(ypad_ref, y, wd_ref[...], bd_ref[...], ml, mr, **dw_cfg)
    out_b = jnp.dot(w2_ref[...], z, preferred_element_type=jnp.float32) + b2_ref[...]
    out_b = jnp.maximum(out_b, 0.0)
    # channel-shuffled output written in-kernel: lanes [:L] = x1 (identity), [L:] = branch2
    o_ref[:, :L] = x[:bf, :].astype(o_ref.dtype)
    o_ref[:, L:] = out_b.astype(o_ref.dtype)


def _dual_branch_kernel(x_ref, m_ref,
                        wd1_ref, bd1_ref, wp1_ref, bp1_ref,
                        w21_ref, b21_ref, wd2_ref, bd2_ref, w22_ref, b22_ref,
                        o_ref, ypad1_ref, ypad2_ref, *, dw_cfg):
    L = dw_cfg["L"]
    x = x_ref[...].astype(jnp.float32)                # (inp, P*L), loaded from HBM ONCE
    ml = m_ref[0:1, :]
    mr = m_ref[1:2, :]
    # branch1: dw3x3(+BN) -> 1x1(+BN)+ReLU
    z1 = _depthwise3x3(ypad1_ref, x, wd1_ref[...], bd1_ref[...], ml, mr, **dw_cfg)
    out_a = jnp.dot(wp1_ref[...], z1, preferred_element_type=jnp.float32) + bp1_ref[...]
    out_a = jnp.maximum(out_a, 0.0)
    # branch2: 1x1(+BN)+ReLU -> dw3x3(+BN) -> 1x1(+BN)+ReLU
    y2 = jnp.dot(w21_ref[...], x, preferred_element_type=jnp.float32)
    y2 = jnp.maximum(y2 + b21_ref[...], 0.0)
    z2 = _depthwise3x3(ypad2_ref, y2, wd2_ref[...], bd2_ref[...], ml, mr, **dw_cfg)
    out_b = jnp.dot(w22_ref[...], z2, preferred_element_type=jnp.float32) + b22_ref[...]
    out_b = jnp.maximum(out_b, 0.0)
    # channel-shuffled output: lanes [:L] = branch1, [L:] = branch2
    o_ref[:, :L] = out_a.astype(o_ref.dtype)
    o_ref[:, L:] = out_b.astype(o_ref.dtype)


# ----------------------------------------------------------------------------
# pallas_call wrappers
# ----------------------------------------------------------------------------
def _full_spec(shape):
    nd = len(shape)
    return pl.BlockSpec(shape, lambda n: (0,) * nd)


def _stride1_call(x_planar, p2, bf, Ho, Wo):
    N, C, L_in = x_planar.shape
    L, P, head, padlen = _dw_layout(1, Ho, Wo)
    assert L_in == L and C == 2 * bf
    masks = _col_masks(Wo, L)
    dw_cfg = dict(groups=_dw_groups(1), L=L, P=P, padlen=padlen, head=head, Wo=Wo, stride=1)
    kernel = functools.partial(_s1_branch_kernel, bf=bf, dw_cfg=dw_cfg)
    operands = [x_planar, masks, p2["w1"], p2["b1"], p2["wd"], p2["bd"], p2["w2"], p2["b2"]]
    in_specs = [pl.BlockSpec((None, C, L), lambda n: (n, 0, 0))]
    in_specs += [_full_spec(op.shape) for op in operands[1:]]
    return pl.pallas_call(
        kernel,
        out_shape=jax.ShapeDtypeStruct((N, bf, 2 * L), x_planar.dtype),
        grid=(N,),
        in_specs=in_specs,
        out_specs=pl.BlockSpec((None, bf, 2 * L), lambda n: (n, 0, 0)),
        scratch_shapes=[pltpu.VMEM((bf, P * padlen), jnp.float32)],
        compiler_params=pltpu.CompilerParams(
            dimension_semantics=("parallel",),
            vmem_limit_bytes=64 * 1024 * 1024),
    )(*operands)


def _strideN_call(xs, p1, p2, inp, bf, stride, Ho, Wo):
    N, C, PL = xs.shape
    L, P, head, padlen = _dw_layout(stride, Ho, Wo)
    assert C == inp and PL == P * L
    masks = _col_masks(Wo, L)
    dw_cfg = dict(groups=_dw_groups(stride), L=L, P=P, padlen=padlen, head=head, Wo=Wo,
                  stride=stride)
    kernel = functools.partial(_dual_branch_kernel, dw_cfg=dw_cfg)
    operands = [xs, masks,
                p1["wd"], p1["bd"], p1["w1"], p1["b1"],
                p2["w1"], p2["b1"], p2["wd"], p2["bd"], p2["w2"], p2["b2"]]
    in_specs = [pl.BlockSpec((None, C, PL), lambda n: (n, 0, 0))]
    in_specs += [_full_spec(op.shape) for op in operands[1:]]
    return pl.pallas_call(
        kernel,
        out_shape=jax.ShapeDtypeStruct((N, bf, 2 * L), xs.dtype),
        grid=(N,),
        in_specs=in_specs,
        out_specs=pl.BlockSpec((None, bf, 2 * L), lambda n: (n, 0, 0)),
        scratch_shapes=[pltpu.VMEM((inp, P * padlen), jnp.float32),
                        pltpu.VMEM((bf, P * padlen), jnp.float32)],
        compiler_params=pltpu.CompilerParams(
            dimension_semantics=("parallel",),
            vmem_limit_bytes=64 * 1024 * 1024),
    )(*operands)


# ----------------------------------------------------------------------------
# Wrapper: layout plumbing (free / single-pass XLA ops) + kernel calls
# ----------------------------------------------------------------------------
def _space_to_depth(x_nchw, s):
    N, C, H, W = x_nchw.shape
    Ho, Wo = H // s, W // s
    x = x_nchw.reshape(N, C, Ho, s, Wo, s)
    x = jnp.transpose(x, (0, 1, 3, 5, 2, 4))       # (N, C, s, s, Ho, Wo)
    return x.reshape(N, C, s * s * Ho * Wo)


def inverted_residual_forward(x_nchw, params, inp, oup, stride):
    N, C, H, W = x_nchw.shape
    assert C == inp
    bf = oup // 2
    p2 = params["branch2"]
    if stride == 1:
        assert inp == 2 * bf
        Ho, Wo = H, W
        x_planar = x_nchw.reshape(N, C, H * W)        # free reshape, no transpose
        out = _stride1_call(x_planar, p2, bf, Ho, Wo)  # (N, bf, 2*L), already shuffled
    else:
        assert H % stride == 0 and W % stride == 0
        Ho, Wo = H // stride, W // stride
        xs = _space_to_depth(x_nchw, stride)           # (N, C, P*Ho*Wo)
        out = _strideN_call(xs, params["branch1"], p2, inp, bf, stride, Ho, Wo)
    # (N, bf, 2, Ho*Wo) -> (N, oup, Ho, Wo) is the channel-shuffle interleave: free reshape.
    return out.reshape(N, oup, Ho, Wo)


# ----------------------------------------------------------------------------
# Deterministic synthetic parameters (eval-mode BatchNorm folded into weights)
# ----------------------------------------------------------------------------
def make_params(key, inp, oup, stride, eps=1e-5):
    """Layouts (channel-major, kernel-ready):
         pointwise conv: w (Cout, Cin) [BN scale folded], b (Cout, 1)
         depthwise 3x3:  w (C, 9) taps in row-major (dh*3+dw) order [BN scale folded], b (C, 1)
    """
    bf = oup // 2
    keys = iter(jax.random.split(key, 20))

    def bn(c):
        k1, k2, k3, k4 = jax.random.split(next(keys), 4)
        gamma = jax.random.uniform(k1, (c,), jnp.float32, 0.5, 1.5)
        beta = jax.random.normal(k2, (c,), jnp.float32) * 0.1
        mean = jax.random.normal(k3, (c,), jnp.float32) * 0.1
        var = jax.random.uniform(k4, (c,), jnp.float32, 0.5, 1.5)
        scale = gamma / jnp.sqrt(var + eps)
        bias = beta - mean * scale
        return scale, bias

    def pw(cin, cout):
        w = jax.random.normal(next(keys), (cout, cin), jnp.float32) / math.sqrt(cin)
        s, b = bn(cout)
        return w * s[:, None], b[:, None]

    def dw(c):
        w = jax.random.normal(next(keys), (c, 9), jnp.float32) * 0.2
        s, b = bn(c)
        return w * s[:, None], b[:, None]

    c_in2 = inp if stride > 1 else bf
    w1, b1 = pw(c_in2, bf)
    wd, bd = dw(bf)
    w2, b2 = pw(bf, bf)
    params = {"branch2": dict(w1=w1, b1=b1, wd=wd, bd=bd, w2=w2, b2=b2)}
    if stride > 1:
        wd1, bd1 = dw(inp)
        w11, b11 = pw(inp, bf)
        params["branch1"] = dict(wd=wd1, bd=bd1, w1=w11, b1=b11)
    return params


# ----------------------------------------------------------------------------
# Pure-JAX reference (correctness check of the fused Pallas kernels)
# ----------------------------------------------------------------------------
def _ref_pw(x, w, b, relu=True):
    y = jax.lax.conv_general_dilated(
        x, w[:, :, None, None], (1, 1), "VALID",
        dimension_numbers=("NCHW", "OIHW", "NCHW"))
    y = y + b.reshape(1, -1, 1, 1)
    return jnp.maximum(y, 0.0) if relu else y


def _ref_dw(x, wd, bd, stride):
    C = x.shape[1]
    w = wd.reshape(C, 1, 3, 3)
    y = jax.lax.conv_general_dilated(
        x, w, (stride, stride), [(1, 1), (1, 1)],
        dimension_numbers=("NCHW", "OIHW", "NCHW"), feature_group_count=C)
    return y + bd.reshape(1, -1, 1, 1)


def _channel_shuffle_nchw(x, groups):
    N, C, H, W = x.shape
    x = x.reshape(N, groups, C // groups, H, W)
    x = jnp.swapaxes(x, 1, 2)
    return x.reshape(N, C, H, W)


def reference_forward(x, params, inp, oup, stride):
    bf = oup // 2
    p2 = params["branch2"]

    def b2(z):
        y = _ref_pw(z, p2["w1"], p2["b1"], True)
        y = _ref_dw(y, p2["wd"], p2["bd"], stride)
        return _ref_pw(y, p2["w2"], p2["b2"], True)

    if stride == 1:
        out = jnp.concatenate([x[:, :bf], b2(x[:, bf:])], axis=1)
    else:
        p1 = params["branch1"]
        y1 = _ref_dw(x, p1["wd"], p1["bd"], stride)
        y1 = _ref_pw(y1, p1["w1"], p1["b1"], True)
        out = jnp.concatenate([y1, b2(x)], axis=1)
    return _channel_shuffle_nchw(out, 2)


# ----------------------------------------------------------------------------
if __name__ == "__main__":
    fwd = jax.jit(inverted_residual_forward, static_argnums=(2, 3, 4))

    # stride = 1 block (requires inp == 2 * (oup // 2))
    inp, oup, stride = 8, 8, 1
    N, H, W = 2, 16, 16
    k_x, k_p = jax.random.split(jax.random.PRNGKey(0))
    x = jax.random.normal(k_x, (N, inp, H, W), jnp.float32)
    params = make_params(k_p, inp, oup, stride)
    out = jax.block_until_ready(fwd(x, params, inp, oup, stride))
    ref = reference_forward(x, params, inp, oup, stride)
    assert out.shape == (N, oup, H, W), out.shape
    assert jnp.allclose(out, ref, atol=1e-4, rtol=1e-4), float(jnp.abs(out - ref).max())

    # stride = 2 downsampling block: branch1 + branch2 fused in ONE kernel
    inp2, oup2, stride2 = 8, 16, 2
    H2, W2 = 32, 32
    x2 = jax.random.normal(jax.random.PRNGKey(2), (N, inp2, H2, W2), jnp.float32)
    params2 = make_params(jax.random.PRNGKey(1), inp2, oup2, stride2)
    out2 = jax.block_until_ready(fwd(x2, params2, inp2, oup2, stride2))
    ref2 = reference_forward(x2, params2, inp2, oup2, stride2)
    assert out2.shape == (N, oup2, H2 // 2, W2 // 2), out2.shape
    assert jnp.allclose(out2, ref2, atol=1e-4, rtol=1e-4), float(jnp.abs(out2 - ref2).max())

    print("KERNEL_OK")
</pallas_src>

<mosaic_0001>
module attributes {stable_mosaic.version = 11 : i64} {
  func.func @_s1_branch_kernel(%arg0: i32, %arg1: memref<1x8x256xf32, #tpu.memory_space<vmem>>, %arg2: memref<2x256xf32, #tpu.memory_space<vmem>>, %arg3: memref<4x4xf32, #tpu.memory_space<vmem>>, %arg4: memref<4x1xf32, #tpu.memory_space<vmem>>, %arg5: memref<4x9xf32, #tpu.memory_space<vmem>>, %arg6: memref<4x1xf32, #tpu.memory_space<vmem>>, %arg7: memref<4x4xf32, #tpu.memory_space<vmem>>, %arg8: memref<4x1xf32, #tpu.memory_space<vmem>>, %arg9: memref<1x4x512xf32, #tpu.memory_space<vmem>>, %arg10: memref<4x512xf32, #tpu.memory_space<vmem>>) attributes {dimension_semantics = [#tpu.dimension_semantics<parallel>], iteration_bounds = array<i64: 2>, scalar_prefetch = 0 : i64, scratch_operands = 1 : i64, tpu.core_type = #tpu.core_type<tc>, window_params = [{transform_indices = @transform_0, window_bounds = array<i64: 1, 8, 256>}, {pipeline_mode = #tpu.pipeline_mode<synchronous>, transform_indices = @transform_1, window_bounds = array<i64: 2, 256>}, {pipeline_mode = #tpu.pipeline_mode<synchronous>, transform_indices = @transform_2, window_bounds = array<i64: 4, 4>}, {pipeline_mode = #tpu.pipeline_mode<synchronous>, transform_indices = @transform_3, window_bounds = array<i64: 4, 1>}, {pipeline_mode = #tpu.pipeline_mode<synchronous>, transform_indices = @transform_4, window_bounds = array<i64: 4, 9>}, {pipeline_mode = #tpu.pipeline_mode<synchronous>, transform_indices = @transform_5, window_bounds = array<i64: 4, 1>}, {pipeline_mode = #tpu.pipeline_mode<synchronous>, transform_indices = @transform_6, window_bounds = array<i64: 4, 4>}, {pipeline_mode = #tpu.pipeline_mode<synchronous>, transform_indices = @transform_7, window_bounds = array<i64: 4, 1>}, {transform_indices = @transform_8, window_bounds = array<i64: 1, 4, 512>}]} {
    %c0 = arith.constant 0 : index
    %c0_0 = arith.constant 0 : index
    %c0_1 = arith.constant 0 : index
    %0 = vector.load %arg1[%c0, %c0_0, %c0_1] : memref<1x8x256xf32, #tpu.memory_space<vmem>>, vector<1x8x256xf32>
    %1 = vector.shape_cast %0 : vector<1x8x256xf32> to vector<8x256xf32>
    %c0_2 = arith.constant 0 : index
    %c0_3 = arith.constant 0 : index
    %2 = vector.load %arg2[%c0_2, %c0_3] : memref<2x256xf32, #tpu.memory_space<vmem>>, vector<1x256xf32>
    %c1 = arith.constant 1 : index
    %c0_4 = arith.constant 0 : index
    %3 = vector.load %arg2[%c1, %c0_4] : memref<2x256xf32, #tpu.memory_space<vmem>>, vector<1x256xf32>
    %c0_5 = arith.constant 0 : index
    %c0_6 = arith.constant 0 : index
    %4 = vector.load %arg3[%c0_5, %c0_6] : memref<4x4xf32, #tpu.memory_space<vmem>>, vector<4x4xf32>
    %5 = vector.extract_strided_slice %1 {offsets = [4, 0], sizes = [4, 256], strides = [1, 1]} : vector<8x256xf32> to vector<4x256xf32>
    %cst = arith.constant dense<0.000000e+00> : vector<4x256xf32>
    %6 = tpu.matmul %4, %5, %cst {dimension_numbers = #tpu.dot_dimension_numbers<[1], [0], [0], [1], [0, 0, 1, 1], [], []>} : vector<4x4xf32>, vector<4x256xf32>, vector<4x256xf32> -> vector<4x256xf32>
    %c0_7 = arith.constant 0 : index
    %c0_8 = arith.constant 0 : index
    %7 = vector.load %arg4[%c0_7, %c0_8] : memref<4x1xf32, #tpu.memory_space<vmem>>, vector<4x1xf32>
    %8 = vector.broadcast %7 : vector<4x1xf32> to vector<4x256xf32>
    %9 = arith.addf %6, %8 : vector<4x256xf32>
    %cst_9 = arith.constant 0.000000e+00 : f32
    %10 = vector.broadcast %cst_9 : f32 to vector<4x256xf32>
    %11 = arith.maximumf %9, %10 : vector<4x256xf32>
    %c0_10 = arith.constant 0 : index
    %c0_11 = arith.constant 0 : index
    %12 = vector.load %arg5[%c0_10, %c0_11] : memref<4x9xf32, #tpu.memory_space<vmem>>, vector<4x9xf32>
    %c0_12 = arith.constant 0 : index
    %c0_13 = arith.constant 0 : index
    %13 = vector.load %arg6[%c0_12, %c0_13] : memref<4x1xf32, #tpu.memory_space<vmem>>, vector<4x1xf32>
    %cst_14 = arith.constant 0.000000e+00 : f32
    %14 = vector.broadcast %cst_14 : f32 to vector<4x16xf32>
    %c0_15 = arith.constant 0 : index
    %c112 = arith.constant 112 : index
    %15 = vector.load %arg10[%c0_15, %c112] : memref<4x512xf32, #tpu.memory_space<vmem>>, vector<4x16xf32>
    tpu.vector_store %arg10[%c0_15, %c112], %14 {strides = array<i32>} : memref<4x512xf32, #tpu.memory_space<vmem>>, vector<4x16xf32>,
    %c0_16 = arith.constant 0 : index
    %c384 = arith.constant 384 : index
    %16 = vector.load %arg10[%c0_16, %c384] : memref<4x512xf32, #tpu.memory_space<vmem>>, vector<4x16xf32>
    tpu.vector_store %arg10[%c0_16, %c384], %14 {strides = array<i32>} : memref<4x512xf32, #tpu.memory_space<vmem>>, vector<4x16xf32>,
    %c0_17 = arith.constant 0 : index
    %c128 = arith.constant 128 : index
    %17 = vector.load %arg10[%c0_17, %c128] : memref<4x512xf32, #tpu.memory_space<vmem>>, vector<4x256xf32>
    tpu.vector_store %arg10[%c0_17, %c128], %11 {strides = array<i32>} : memref<4x512xf32, #tpu.memory_space<vmem>>, vector<4x256xf32>,
    %c0_18 = arith.constant 0 : index
    %c112_19 = arith.constant 112 : index
    %18 = vector.load %arg10[%c0_18, %c112_19] : memref<4x512xf32, #tpu.memory_space<vmem>>, vector<4x256xf32>
    %19 = vector.extract_strided_slice %12 {offsets = [0, 0], sizes = [4, 1], strides = [1, 1]} : vector<4x9xf32> to vector<4x1xf32>
    %c1_i32 = arith.constant 1 : i32
    %20 = tpu.dynamic_rotate %18 by %c1_i32 dim 1 : vector<4x256xf32>, i32 -> vector<4x256xf32>
    %21 = vector.broadcast %19 : vector<4x1xf32> to vector<4x256xf32>
    %22 = arith.mulf %21, %20 : vector<4x256xf32>
    %23 = vector.broadcast %2 : vector<1x256xf32> to vector<4x256xf32>
    %24 = arith.mulf %22, %23 : vector<4x256xf32>
    %25 = vector.extract_strided_slice %12 {offsets = [0, 1], sizes = [4, 1], strides = [1, 1]} : vector<4x9xf32> to vector<4x1xf32>
    %26 = vector.broadcast %25 : vector<4x1xf32> to vector<4x256xf32>
    %27 = arith.mulf %26, %18 : vector<4x256xf32>
    %28 = arith.addf %24, %27 : vector<4x256xf32>
    %29 = vector.extract_strided_slice %12 {offsets = [0, 2], sizes = [4, 1], strides = [1, 1]} : vector<4x9xf32> to vector<4x1xf32>
    %c255_i32 = arith.constant 255 : i32
    %30 = tpu.dynamic_rotate %18 by %c255_i32 dim 1 : vector<4x256xf32>, i32 -> vector<4x256xf32>
    %31 = vector.broadcast %29 : vector<4x1xf32> to vector<4x256xf32>
    %32 = arith.mulf %31, %30 : vector<4x256xf32>
    %33 = vector.broadcast %3 : vector<1x256xf32> to vector<4x256xf32>
    %34 = arith.mulf %32, %33 : vector<4x256xf32>
    %35 = arith.addf %28, %34 : vector<4x256xf32>
    %c0_20 = arith.constant 0 : index
    %c128_21 = arith.constant 128 : index
    %36 = vector.load %arg10[%c0_20, %c128_21] : memref<4x512xf32, #tpu.memory_space<vmem>>, vector<4x256xf32>
    %37 = vector.extract_strided_slice %12 {offsets = [0, 3], sizes = [4, 1], strides = [1, 1]} : vector<4x9xf32> to vector<4x1xf32>
    %c1_i32_22 = arith.constant 1 : i32
    %38 = tpu.dynamic_rotate %36 by %c1_i32_22 dim 1 : vector<4x256xf32>, i32 -> vector<4x256xf32>
    %39 = vector.broadcast %37 : vector<4x1xf32> to vector<4x256xf32>
    %40 = arith.mulf %39, %38 : vector<4x256xf32>
    %41 = vector.broadcast %2 : vector<1x256xf32> to vector<4x256xf32>
    %42 = arith.mulf %40, %41 : vector<4x256xf32>
    %43 = arith.addf %35, %42 : vector<4x256xf32>
    %44 = vector.extract_strided_slice %12 {offsets = [0, 4], sizes = [4, 1], strides = [1, 1]} : vector<4x9xf32> to vector<4x1xf32>
    %45 = vector.broadcast %44 : vector<4x1xf32> to vector<4x256xf32>
    %46 = arith.mulf %45, %36 : vector<4x256xf32>
    %47 = arith.addf %43, %46 : vector<4x256xf32>
    %48 = vector.extract_strided_slice %12 {offsets = [0, 5], sizes = [4, 1], strides = [1, 1]} : vector<4x9xf32> to vector<4x1xf32>
    %c255_i32_23 = arith.constant 255 : i32
    %49 = tpu.dynamic_rotate %36 by %c255_i32_23 dim 1 : vector<4x256xf32>, i32 -> vector<4x256xf32>
    %50 = vector.broadcast %48 : vector<4x1xf32> to vector<4x256xf32>
    %51 = arith.mulf %50, %49 : vector<4x256xf32>
    %52 = vector.broadcast %3 : vector<1x256xf32> to vector<4x256xf32>
    %53 = arith.mulf %51, %52 : vector<4x256xf32>
    %54 = arith.addf %47, %53 : vector<4x256xf32>
    %c0_24 = arith.constant 0 : index
    %c144 = arith.constant 144 : index
    %55 = vector.load %arg10[%c0_24, %c144] : memref<4x512xf32, #tpu.memory_space<vmem>>, vector<4x256xf32>
    %56 = vector.extract_strided_slice %12 {offsets = [0, 6], sizes = [4, 1], strides = [1, 1]} : vector<4x9xf32> to vector<4x1xf32>
    %c1_i32_25 = arith.constant 1 : i32
    %57 = tpu.dynamic_rotate %55 by %c1_i32_25 dim 1 : vector<4x256xf32>, i32 -> vector<4x256xf32>
    %58 = vector.broadcast %56 : vector<4x1xf32> to vector<4x256xf32>
    %59 = arith.mulf %58, %57 : vector<4x256xf32>
    %60 = vector.broadcast %2 : vector<1x256xf32> to vector<4x256xf32>
    %61 = arith.mulf %59, %60 : vector<4x256xf32>
    %62 = arith.addf %54, %61 : vector<4x256xf32>
    %63 = vector.extract_strided_slice %12 {offsets = [0, 7], sizes = [4, 1], strides = [1, 1]} : vector<4x9xf32> to vector<4x1xf32>
    %64 = vector.broadcast %63 : vector<4x1xf32> to vector<4x256xf32>
    %65 = arith.mulf %64, %55 : vector<4x256xf32>
    %66 = arith.addf %62, %65 : vector<4x256xf32>
    %67 = vector.extract_strided_slice %12 {offsets = [0, 8], sizes = [4, 1], strides = [1, 1]} : vector<4x9xf32> to vector<4x1xf32>
    %c255_i32_26 = arith.constant 255 : i32
    %68 = tpu.dynamic_rotate %55 by %c255_i32_26 dim 1 : vector<4x256xf32>, i32 -> vector<4x256xf32>
    %69 = vector.broadcast %67 : vector<4x1xf32> to vector<4x256xf32>
    %70 = arith.mulf %69, %68 : vector<4x256xf32>
    %71 = vector.broadcast %3 : vector<1x256xf32> to vector<4x256xf32>
    %72 = arith.mulf %70, %71 : vector<4x256xf32>
    %73 = arith.addf %66, %72 : vector<4x256xf32>
    %74 = vector.broadcast %13 : vector<4x1xf32> to vector<4x256xf32>
    %75 = arith.addf %73, %74 : vector<4x256xf32>
    %c0_27 = arith.constant 0 : index
    %c0_28 = arith.constant 0 : index
    %76 = vector.load %arg7[%c0_27, %c0_28] : memref<4x4xf32, #tpu.memory_space<vmem>>, vector<4x4xf32>
    %cst_29 = arith.constant dense<0.000000e+00> : vector<4x256xf32>
    %77 = tpu.matmul %76, %75, %cst_29 {dimension_numbers = #tpu.dot_dimension_numbers<[1], [0], [0], [1], [0, 0, 1, 1], [], []>} : vector<4x4xf32>, vector<4x256xf32>, vector<4x256xf32> -> vector<4x256xf32>
    %c0_30 = arith.constant 0 : index
    %c0_31 = arith.constant 0 : index
    %78 = vector.load %arg8[%c0_30, %c0_31] : memref<4x1xf32, #tpu.memory_space<vmem>>, vector<4x1xf32>
    %79 = vector.broadcast %78 : vector<4x1xf32> to vector<4x256xf32>
    %80 = arith.addf %77, %79 : vector<4x256xf32>
    %cst_32 = arith.constant 0.000000e+00 : f32
    %81 = vector.broadcast %cst_32 : f32 to vector<4x256xf32>
    %82 = arith.maximumf %80, %81 : vector<4x256xf32>
    %83 = vector.extract_strided_slice %1 {offsets = [0, 0], sizes = [4, 256], strides = [1, 1]} : vector<8x256xf32> to vector<4x256xf32>
    %c0_33 = arith.constant 0 : index
    %c0_34 = arith.constant 0 : index
    %c0_35 = arith.constant 0 : index
    %84 = vector.load %arg9[%c0_33, %c0_34, %c0_35] : memref<1x4x512xf32, #tpu.memory_space<vmem>>, vector<1x4x256xf32>
    %85 = vector.shape_cast %84 : vector<1x4x256xf32> to vector<4x256xf32>
    %86 = vector.shape_cast %83 : vector<4x256xf32> to vector<1x4x256xf32>
    tpu.vector_store %arg9[%c0_33, %c0_34, %c0_35], %86 {strides = array<i32>} : memref<1x4x512xf32, #tpu.memory_space<vmem>>, vector<1x4x256xf32>,
    %c0_36 = arith.constant 0 : index
    %c0_37 = arith.constant 0 : index
    %c256 = arith.constant 256 : index
    %87 = vector.load %arg9[%c0_36, %c0_37, %c256] : memref<1x4x512xf32, #tpu.memory_space<vmem>>, vector<1x4x256xf32>
    %88 = vector.shape_cast %87 : vector<1x4x256xf32> to vector<4x256xf32>
    %89 = vector.shape_cast %82 : vector<4x256xf32> to vector<1x4x256xf32>
    tpu.vector_store %arg9[%c0_36, %c0_37, %c256], %89 {strides = array<i32>} : memref<1x4x512xf32, #tpu.memory_space<vmem>>, vector<1x4x256xf32>,
    return
  }
  func.func @transform_0(%arg0: i32) -> (i32, i32, i32) {
    %c0_i32 = arith.constant 0 : i32
    %c0_i32_0 = arith.constant 0 : i32
    %c0_i32_1 = arith.constant 0 : i32
    return %arg0, %c0_i32, %c0_i32_0 : i32, i32, i32
  }
  func.func @transform_1(%arg0: i32) -> (i32, i32) {
    %c0_i32 = arith.constant 0 : i32
    %c0_i32_0 = arith.constant 0 : i32
    %c0_i32_1 = arith.constant 0 : i32
    return %c0_i32, %c0_i32_0 : i32, i32
  }
  func.func @transform_2(%arg0: i32) -> (i32, i32) {
    %c0_i32 = arith.constant 0 : i32
    %c0_i32_0 = arith.constant 0 : i32
    %c0_i32_1 = arith.constant 0 : i32
    return %c0_i32, %c0_i32_0 : i32, i32
  }
  func.func @transform_3(%arg0: i32) -> (i32, i32) {
    %c0_i32 = arith.constant 0 : i32
    %c0_i32_0 = arith.constant 0 : i32
    %c0_i32_1 = arith.constant 0 : i32
    return %c0_i32, %c0_i32_0 : i32, i32
  }
  func.func @transform_4(%arg0: i32) -> (i32, i32) {
    %c0_i32 = arith.constant 0 : i32
    %c0_i32_0 = arith.constant 0 : i32
    %c0_i32_1 = arith.constant 0 : i32
    return %c0_i32, %c0_i32_0 : i32, i32
  }
  func.func @transform_5(%arg0: i32) -> (i32, i32) {
    %c0_i32 = arith.constant 0 : i32
    %c0_i32_0 = arith.constant 0 : i32
    %c0_i32_1 = arith.constant 0 : i32
    return %c0_i32, %c0_i32_0 : i32, i32
  }
  func.func @transform_6(%arg0: i32) -> (i32, i32) {
    %c0_i32 = arith.constant 0 : i32
    %c0_i32_0 = arith.constant 0 : i32
    %c0_i32_1 = arith.constant 0 : i32
    return %c0_i32, %c0_i32_0 : i32, i32
  }
  func.func @transform_7(%arg0: i32) -> (i32, i32) {
    %c0_i32 = arith.constant 0 : i32
    %c0_i32_0 = arith.constant 0 : i32
    %c0_i32_1 = arith.constant 0 : i32
    return %c0_i32, %c0_i32_0 : i32, i32
  }
  func.func @transform_8(%arg0: i32) -> (i32, i32, i32) {
    %c0_i32 = arith.constant 0 : i32
    %c0_i32_0 = arith.constant 0 : i32
    %c0_i32_1 = arith.constant 0 : i32
    return %arg0, %c0_i32, %c0_i32_0 : i32, i32, i32
  }
}

</mosaic_0001>

<bundles_post_ra>
// kernel: inverted_residual_forward.1
= control target key start
LH: loop header
LB: loop body
LE: loop exit
PB: predicated region body
PF: predicated region fallthrough
CT: control target
= control target key end

     0   :  { %s879_s27 = smov 0   ;;  %s1011_s0 = inlined_call_operand.vmem [shape: f32[2,8,256], index: 0, kind: input, shape index: {}]   ;;  %s1012_s1 = inlined_call_operand.vmem [shape: f32[2,256], index: 1, kind: input, shape index: {}]   ;;  %s1013_s2 = inlined_call_operand.vmem [shape: f32[4,4], index: 2, kind: input, shape index: {}]   ;;  %s1014_s3 = inlined_call_operand.vmem [shape: f32[4,1], index: 3, kind: input, shape index: {}]   ;;  %s1015_s4 = inlined_call_operand.vmem [shape: f32[4,9], index: 4, kind: input, shape index: {}]   ;;  %s1016_s5 = inlined_call_operand.vmem [shape: f32[4,1], index: 5, kind: input, shape index: {}]   ;;  %s1017_s6 = inlined_call_operand.vmem [shape: f32[4,4], index: 6, kind: input, shape index: {}]   ;;  %s1018_s7 = inlined_call_operand.vmem [shape: f32[4,1], index: 7, kind: input, shape index: {}]   ;;  %s1019_s8 = inlined_call_operand.vmem [shape: f32[2,4,512], index: 8, kind: output, shape index: {}]  }
   0x1 LB: > { %s755_s28 = sadd.s32 4294967295, %s818_s27   ;;  %p759_p0 = scmp.ge.s32.totalorder %s818_s27, 1  ;;  %s818_s27 = sphi %s879_s27, %s18_s27  }
   0x2   : > { %p262_p1 = scmp.lt.s32.totalorder %s818_s27, 3 }
   0x4   : > { %p263_p2 = pnand %p759_p0, %p262_p1 }
   0x5   : > { %p296_p3 = scmp.lt.s32.totalorder (!%p263_p2), %s755_s28, 1  ;;  %s823_s18 = smov (!%p263_p2), 16  }
   0x6   : > { %266 = sbr.rel (%p263_p2) target bundleno = 703 (0x2bf), region = 52  ;;  %s824_s19 = smov (!%p263_p2), 112  }
   0x7   : > { %s825_s22 = smov (!%p263_p2), 1   ;;  %s829_s23 = smov (!%p263_p2), 127  }
   0xb   : > { %vm406_vm0 = vcmask 1044352   ;;  %vm408_vm1 = vcmask 125952   ;;  %v820_v0 = vmov 0.0   ;;  %v312_v1 = vld [vmem:[%s1014_s3] sm:$0xf]  ;;  %s1021_s28 = smov (!%p296_p3, %s755_s28), 1  ;;  %v435_v52 = vlaneseq }
   0xc   : > { %395 = vmatprep.mubr.f32.mxu0 %v820_v0  ;;  %407 = vst.msk [vmem:[#allocation2] sm:$0xf] %vm406_vm0, %v820_v0  ;;  %683 = vmatprep.mubr.f32.mxu1 %v820_v0  ;;  %v821_v2 = vmov 0   ;;  %s773_s9 = sshll.u32 %s1021_s28, 4  ;;  %vm326_vm2 = vcmask 1043456   ;;  %vm322_vm3 = vcmask 31744  }
   0xd   : > { %409 = vst.msk [vmem:[#allocation2 + $0xc] sm:$0xf] %vm408_vm1, %v820_v0  ;;  %797 = vset.pattern.permute.xlu0 %v821_v2  ;;  %798 = vset.pattern.permute.xlu1 %v821_v2  ;;  %s300_s12 = scalar_lea.vmem %s1011_s0, %s773_s9  ;;  %s898_s15 = scalar_lea.vmem %s1019_s8, %s773_s9  ;;  %v311_v8 = vld [vmem:[%s1013_s2] sm:$0xf]  ;;  %v822_v9 = vmov 1   ;;  %v826_v24 = vmov 4  }
   0xe   : > { %315 = vperm.xlu0 %797, %v312_v1   ;;  %v306_v3 = vld [vmem:[%s300_s12] sm:$0xff]  ;;  %v307_v4 = vld [vmem:[%s300_s12 + $0x8] sm:$0xff]  ;;  %v827_v25 = vmov 2   ;;  %v828_v26 = vmov 3   ;;  %v830_v27 = vmov 7   ;;  %v831_v28 = vmov 5  }
   0xf   : > { %v321_v5 = vrot.slane %v307_v4, 4  ;;  %v692_v6 = vcombine.low %v306_v3, %v307_v4  ;;  %v320_v7 = vrot.slane %v306_v3, 4  ;;  %v404_v23 = vld [vmem:[%s1015_s4] sm:$0xf]  ;;  %v832_v29 = vmov 6  }
  0x10   : > { %v833_v30 = vmov 8   ;;  %vm426_vm4 = vcmask 130048   ;;  %vm551_vm5 = vcmask 916480   ;;  %v405_v41 = vld [vmem:[%s1016_s5] sm:$0xf]  ;;  %v959_v55 = vand.u32 127, %v435_v52 }
  0x11   : > { %765 = vmatprep.subr.msk.mxu0 %vm326_vm2, %v321_v5  ;;  %694 = vst [vmem:[%s898_s15] sm:$0xff] %v692_v6  ;;  %v604_v42 = vld [vmem:[%s1018_s7] sm:$0xf]  ;;  %v449_v56 = vshrl.u32 %v435_v52, 7 }
  0x12   : > { %766 = vmatpush1.msk.msra.mxu0 %vm326_vm2, %v320_v7  ;;  %799 = vset.pattern.permute.xlu0 %v822_v9  ;;  %vm437_vm6 = vcmp.lt.s32.totalorder %v959_v55, 1  ;;  %v308_v63 = vld [vmem:[%s1012_s1] ss:$2 sm:$0x3]  ;;  %vm472_vm7 = vcmp.lt.s32.totalorder %v959_v55, 127 }
  0x13   : > { %767 = vmatmul.mubr.msk.f32.vlgmr.msra.gmra.mxu0 %vm322_vm3, %v311_v8  ;;  %v450_v59 = vsub.s32 0, %v449_v56  ;;  %v454_v60 = vsub.s32 1, %v449_v56 }
  0x14   : > { %v541_v21 = vld [vmem:[#allocation2 + $0xc] sm:$0xf] }
  0x15   : > { %v451_v5 = vrot.slane %v308_v63, %v450_v59  ;;  %v455_v6 = vrot.slane %v308_v63, %v454_v60 }
  0x89   : > { %v316_v10 = vpop.permute.xlu0 %315 }
  0xd3   : > { %v397_v11 = vpop.f32.mrf.mxu0 }
  0xd4   : > { %v398_v12 = vadd.f32 %v397_v11, %v316_v10 }
  0xd5   : > { %v399_v13 = vpop.f32.mrf.mxu0 }
  0xd6   : > { %v400_v14 = vadd.f32 %v399_v13, %v316_v10  ;;  %v402_v15 = vmax.f32 %v398_v12, 0.0 }
  0xd8   : > { %v403_v16 = vmax.f32 %v400_v14, 0.0 }
  0xda   : > { %v907_v17 = vcombine.low %v402_v15, %v403_v16  ;;  %v911_v22 = vcombine.low %v403_v16, %v403_v16 }
  0xdc   : > { %414 = vst [vmem:[#allocation2 + $0x4] sm:$0xff] %v907_v17 }
  0xe3   : > { %v415_v18 = vld [vmem:[#allocation2] sm:$0xff]  ;;  %v416_v20 = vld [vmem:[#allocation2 + $0x8] sm:$0xf] }
  0xe4   : > { %420 = vrot.lane.b32.xlu0 %v415_v18, %s823_s18  ;;  %v419_v19 = vcombine.high %v415_v18, %v415_v18 }
  0xe6   : > { %422 = vrot.lane.b32.xlu1 %v419_v19, %s823_s18 }
  0xe8   : > { %545 = vrot.lane.b32.xlu0 %v907_v17, %s824_s19 }
  0xea   : > { %424 = vrot.lane.b32.xlu1 %v416_v20, %s823_s18 }
  0xec   : > { %549 = vrot.lane.b32.xlu0 %v541_v21, %s824_s19 }
  0xee   : > { %547 = vrot.lane.b32.xlu1 %v911_v22, %s824_s19 }
  0xf0   : > { %461 = vperm.xlu0 %799, %v404_v23  }
  0xf2   : > { %442 = vperm.xlu1 %798, %v404_v23  }
  0xf4   : > { %500 = vrot.lane.b32.xlu0 %v907_v17, %s825_s22 }
  0xf5   : > { %802 = vset.pattern.permute.xlu0 %v826_v24 }
  0xf6   : > { %800 = vset.pattern.permute.xlu1 %v827_v25 }
  0xf7   : > { %476 = vperm.xlu1 %800, %v404_v23  }
  0xf8   : > { %517 = vperm.xlu0 %802, %v404_v23  }
  0xfb   : > { %801 = vset.pattern.permute.xlu1 %v828_v26 }
  0xfc   : > { %524 = vrot.lane.b32.xlu0 %v907_v17, %s829_s23  ;;  %507 = vperm.xlu1 %801, %v404_v23  }
  0xfd   : > { %805 = vset.pattern.permute.xlu0 %v830_v27 }
 0x100   : > { %803 = vset.pattern.permute.xlu1 %v831_v28 }
 0x101   : > { %531 = vperm.xlu1 %803, %v404_v23  }
 0x105   : > { %804 = vset.pattern.permute.xlu1 %v832_v29 }
 0x106   : > { %563 = vperm.xlu1 %804, %v404_v23  }
 0x10a   : > { %502 = vrot.lane.b32.xlu1 %v911_v22, %s825_s22 }
 0x10b   : > { %806 = vset.pattern.permute.xlu1 %v833_v30 }
 0x10e   : > { %526 = vrot.lane.b32.xlu1 %v911_v22, %s829_s23 }
 0x156   : > { %v421_v31 = vpop.permute.xlu0 %420 }
 0x158   : > { %v423_v32 = vpop.permute.xlu1 %422 }
 0x159   : > { %v925_v33 = vsel %vm426_vm4, %v421_v31, %v423_v32 }
 0x15a   : > { %431 = vrot.lane.b32.xlu1 %v925_v33, %s825_s22  ;;  %v546_v36 = vpop.permute.xlu0 %545 }
 0x15c   : > { %v425_v34 = vpop.permute.xlu1 %424 }
 0x15d   : > { %v929_v35 = vsel %vm426_vm4, %v423_v32, %v425_v34 }
 0x15e   : > { %470 = vrot.lane.b32.xlu1 %v929_v35, %s829_s23  ;;  %433 = vrot.lane.b32.xlu0 %v929_v35, %s825_s22  ;;  %v550_v37 = vpop.permute.xlu0 %549 }
 0x160   : > { %v548_v38 = vpop.permute.xlu1 %547 }
 0x161   : > { %v937_v39 = vsel %vm551_vm5, %v548_v38, %v550_v37  ;;  %v942_v40 = vsel %vm551_vm5, %v546_v36, %v548_v38 }
 0x162   : > { %587 = vperm.xlu1 %806, %v404_v23   ;;  %468 = vrot.lane.b32.xlu0 %v925_v33, %s829_s23 }
 0x166   : > { %573 = vperm.xlu0 %805, %v404_v23   ;;  %558 = vrot.lane.b32.xlu1 %v937_v39, %s825_s22 }
 0x167   : > { %807 = vset.pattern.permute.xlu1 %v821_v2 }
 0x16a   : > { %580 = vrot.lane.b32.xlu1 %v942_v40, %s829_s23  ;;  %556 = vrot.lane.b32.xlu0 %v942_v40, %s825_s22 }
 0x16b   : > { %808 = vset.pattern.permute.xlu0 %v821_v2  ;;  %v462_v47 = vpop.permute.xlu0 %461  ;;  %v764_v2 = vld [vmem:[%s1012_s1 + $0x1] ss:$2 sm:$0x3] }
 0x16c   : > { %v485_v11 = vrot.slane %v764_v2, %v450_v59  ;;  %v489_v12 = vrot.slane %v764_v2, %v454_v60  ;;  %v464_v18 = vmul.f32 %v462_v47, %v925_v33  ;;  %v465_v19 = vmul.f32 %v462_v47, %v929_v35 }
 0x16d   : > { %v443_v43 = vpop.permute.xlu1 %442 }
 0x16e   : > { %582 = vrot.lane.b32.xlu0 %v937_v39, %s829_s23  ;;  %598 = vperm.xlu1 %807, %v405_v41  }
 0x16f   : > { %v501_v49 = vpop.permute.xlu0 %500 }
 0x172   : > { %607 = vperm.xlu0 %808, %v604_v42   ;;  %v477_v44 = vpop.permute.xlu1 %476 }
 0x173   : > { %v518_v51 = vpop.permute.xlu0 %517 }
 0x174   : > { %v520_v37 = vmul.f32 %v518_v51, %v907_v17  ;;  %v521_v38 = vmul.f32 %v911_v22, %v518_v51 }
 0x177   : > { %v508_v45 = vpop.permute.xlu1 %507  ;;  %v525_v54 = vpop.permute.xlu0 %524 }
 0x17c   : > { %v532_v46 = vpop.permute.xlu1 %531 }
 0x181   : > { %v957_v48 = vpop.permute.xlu1 %563 }
 0x185   : > { %v503_v50 = vpop.permute.xlu1 %502 }
 0x186   : > { %v504_v15 = vsel %vm437_vm6, %v501_v49, %v503_v50  ;;  %v505_v16 = vsel %vm437_vm6, %v503_v50, %v501_v49 }
 0x187   : > { %v510_v23 = vmul.f32 %v508_v45, %v505_v16  ;;  %v511_v24 = vmul.f32 %v508_v45, %v504_v15 }
 0x189   : > { %v527_v53 = vpop.permute.xlu1 %526  ;;  %v512_v30 = vmul.f32 %v510_v23, %v451_v5  ;;  %v513_v31 = vmul.f32 %v511_v24, %v455_v6 }
 0x18a   : > { %v528_v32 = vsel %vm472_vm7, %v525_v54, %v527_v53  ;;  %v529_v34 = vsel %vm472_vm7, %v527_v53, %v525_v54 }
 0x18b   : > { %v534_v41 = vmul.f32 %v532_v46, %v528_v32  ;;  %v535_v42 = vmul.f32 %v532_v46, %v529_v34 }
 0x18d   : > { %v536_v52 = vmul.f32 %v534_v41, %v485_v11  ;;  %v537_v53 = vmul.f32 %v535_v42, %v489_v12 }
 0x1cc   : > { %v432_v57 = vpop.permute.xlu1 %431 }
 0x1d0   : > { %v434_v58 = vpop.permute.xlu0 %433  ;;  %v471_v3 = vpop.permute.xlu1 %470 }
 0x1d1   : > { %v438_v61 = vsel %vm437_vm6, %v432_v57, %v434_v58  ;;  %v439_v62 = vsel %vm437_vm6, %v434_v58, %v432_v57 }
 0x1d2   : > { %v445_v0 = vmul.f32 %v443_v43, %v439_v62  ;;  %v446_v1 = vmul.f32 %v443_v43, %v438_v61 }
 0x1d4   : > { %v469_v4 = vpop.permute.xlu0 %468  ;;  %v458_v13 = vmul.f32 %v451_v5, %v445_v0  ;;  %v459_v14 = vmul.f32 %v455_v6, %v446_v1 }
 0x1d5   : > { %v473_v7 = vsel %vm472_vm7, %v469_v4, %v471_v3  ;;  %v474_v8 = vsel %vm472_vm7, %v471_v3, %v469_v4 }
 0x1d6   : > { %v479_v9 = vmul.f32 %v477_v44, %v473_v7  ;;  %v480_v10 = vmul.f32 %v477_v44, %v474_v8  ;;  %v466_v25 = vadd.f32 %v464_v18, %v458_v13  ;;  %v467_v26 = vadd.f32 %v465_v19, %v459_v14 }
 0x1d8   : > { %v492_v20 = vmul.f32 %v485_v11, %v479_v9  ;;  %v493_v21 = vmul.f32 %v489_v12, %v480_v10  ;;  %v603_v9 = vld [vmem:[%s1017_s6] sm:$0xf] }
 0x1da   : > { %v494_v27 = vadd.f32 %v492_v20, %v466_v25  ;;  %v495_v28 = vadd.f32 %v493_v21, %v467_v26 }
 0x1dc   : > { %v514_v33 = vadd.f32 %v512_v30, %v494_v27  ;;  %v515_v36 = vadd.f32 %v513_v31, %v495_v28 }
 0x1dd   : > { %v588_v29 = vpop.permute.xlu1 %587 }
 0x1de   : > { %v522_v45 = vadd.f32 %v520_v37, %v514_v33  ;;  %v523_v47 = vadd.f32 %v521_v38, %v515_v36 }
 0x1e0   : > { %v538_v57 = vadd.f32 %v536_v52, %v522_v45  ;;  %v539_v58 = vadd.f32 %v537_v53, %v523_v47 }
 0x1e1   : > { %v574_v35 = vpop.permute.xlu0 %573  ;;  %v559_v43 = vpop.permute.xlu1 %558 }
 0x1e2   : > { %v576_v59 = vmul.f32 %v574_v35, %v942_v40  ;;  %v577_v60 = vmul.f32 %v574_v35, %v937_v39 }
 0x1e5   : > { %v557_v44 = vpop.permute.xlu0 %556  ;;  %v581_v51 = vpop.permute.xlu1 %580 }
 0x1e6   : > { %v560_v49 = vsel %vm437_vm6, %v557_v44, %v559_v43  ;;  %v561_v50 = vsel %vm437_vm6, %v559_v43, %v557_v44 }
 0x1e7   : > { %v566_v54 = vmul.f32 %v957_v48, %v561_v50  ;;  %v567_v17 = vmul.f32 %v957_v48, %v560_v49 }
 0x1e9   : > { %v568_v56 = vmul.f32 %v566_v54, %v451_v5  ;;  %v569_v22 = vmul.f32 %v567_v17, %v455_v6  ;;  %v583_v46 = vpop.permute.xlu0 %582  ;;  %v599_v6 = vpop.permute.xlu1 %598 }
 0x1ea   : > { %v584_v61 = vsel %vm472_vm7, %v581_v51, %v583_v46  ;;  %v585_v62 = vsel %vm472_vm7, %v583_v46, %v581_v51 }
 0x1eb   : > { %v590_v63 = vmul.f32 %v588_v29, %v584_v61  ;;  %v591_v0 = vmul.f32 %v588_v29, %v585_v62  ;;  %v570_v1 = vadd.f32 %v568_v56, %v538_v57  ;;  %v571_v48 = vadd.f32 %v569_v22, %v539_v58 }
 0x1ed   : > { %v578_v2 = vadd.f32 %v576_v59, %v570_v1  ;;  %v579_v3 = vadd.f32 %v577_v60, %v571_v48  ;;  %v592_v4 = vmul.f32 %v590_v63, %v485_v11  ;;  %v593_v5 = vmul.f32 %v591_v0, %v489_v12  ;;  %v608_v55 = vpop.permute.xlu0 %607 }
 0x1ef   : > { %v594_v7 = vadd.f32 %v592_v4, %v578_v2  ;;  %v595_v40 = vadd.f32 %v593_v5, %v579_v3 }
 0x1f1   : > { %v601_v8 = vadd.f32 %v599_v6, %v594_v7  ;;  %v602_v39 = vadd.f32 %v599_v6, %v595_v40 }
 0x1f3   : > { %768 = vmatprep.subr.msk.mxu1 %vm326_vm2, %v602_v39 }
 0x1f4   : > { %769 = vmatpush1.msk.msra.mxu1 %vm326_vm2, %v601_v8 }
 0x1f5   : > { %770 = vmatmul.mubr.msk.f32.vlgmr.msra.gmra.mxu1 %vm322_vm3, %v603_v9 }
 0x2b5   : > { %v685_v10 = vpop.f32.mrf.mxu1 }
 0x2b6   : > { %v686_v11 = vadd.f32 %v685_v10, %v608_v55 }
 0x2b7   : > { %v687_v12 = vpop.f32.mrf.mxu1 }
 0x2b8   : > { %v688_v13 = vadd.f32 %v687_v12, %v608_v55  ;;  %v690_v14 = vmax.f32 %v686_v11, 0.0 }
 0x2ba   : > { %v691_v15 = vmax.f32 %v688_v13, 0.0 }
 0x2bc   : > { %v697_v16 = vcombine.low %v690_v14, %v691_v15 }
 0x2be   : > { %699 = vst [vmem:[%s898_s15 + $0x8] sm:$0xff] %v697_v16 }
 0x2bf PF: > { %s18_s27 = sadd.s32 1, %s818_s27  }
 0x2c0   : > { %p15_p4 = scmp.ge.s32.totalorder %s18_s27, 4  }
 0x2c2   :  { %17 = sbr.rel (!%p15_p4) target bundleno = 1 (0x1), region = 83 }

</bundles_post_ra>
